<compile_context>
chip_gen: v7x
topology: tpu7x:2x2x1
jax: 0.10.0
libtpu: 0.0.40
codegen_flags: <defaults>
</compile_context>

<pallas_src>
import jax
import jax.numpy as jnp
from jax.experimental import pallas as pl
from jax.experimental.pallas import tpu as pltpu


# --------------------------------- kernel -----------------------------------

def bottleneck_resblock_kernel(
    x_ref,       # (1, TL, D)      sequence tile (f32)
    halo_ref,    # (1, 1, 2p, D)   pad rows above + pad rows below this tile
    lnw_ref,     # (1, D)          LayerNorm weight (f32)
    lnb_ref,     # (1, D)          LayerNorm bias   (f32)
    convw_ref,   # (K*D, D)        fused conv weight [tap-major, in, out] (bf16)
    convb_ref,   # (1, D)          conv bias (f32)
    w1_ref,      # (D, 2D)         Linear1 weight, transposed (bf16)
    b1_ref,      # (1, 2D)         Linear1 bias (f32)
    w2_ref,      # (2D, D)         Linear2 weight, transposed (bf16)
    b2_ref,      # (1, D)          Linear2 bias (f32)
    o_ref,       # (1, TL, D)      output tile
):
    TL = x_ref.shape[1]
    D = x_ref.shape[2]
    two_pad = halo_ref.shape[2]
    pad = two_pad // 2
    K = convw_ref.shape[0] // D

    l = pl.program_id(1)
    L_total = pl.num_programs(1) * TL

    gamma = lnw_ref[...].astype(jnp.float32)      # (1, D)
    beta = lnb_ref[...].astype(jnp.float32)

    # ---- extended slab: [pad halo-above | TL tile rows | pad halo-below] ----
    xe = jnp.concatenate(
        [halo_ref[0, 0, :pad, :], x_ref[0], halo_ref[0, 0, pad:, :]],
        axis=0,
    ).astype(jnp.float32)                          # (TL + 2*pad, D)

    # ---- LayerNorm over the whole slab (f32 math) ---------------------------
    mu = jnp.mean(xe, axis=-1, keepdims=True)
    cen = xe - mu
    var = jnp.mean(cen * cen, axis=-1, keepdims=True)
    xn = cen * jax.lax.rsqrt(var + 1e-5) * gamma + beta

    # Conv1d's zero padding acts on the LayerNorm output: zero-mask slab rows
    # that fall outside [0, L).  Only the edge tiles have any invalid rows.
    g = jax.lax.broadcasted_iota(jnp.int32, (TL + two_pad, 1), 0) + (l * TL - pad)
    valid = jnp.logical_and(g >= 0, g < L_total)
    xn = jnp.where(valid, xn, 0.0).astype(jnp.bfloat16)    # (TL + 2*pad, D)

    # ---- conv: K statically shifted views -> ONE deep (TL,K*D)@(K*D,D) MXU --
    cat = jnp.concatenate([xn[k:k + TL, :] for k in range(K)], axis=-1)
    y = jnp.dot(cat, convw_ref[...],
                preferred_element_type=jnp.float32) + convb_ref[...]    # (TL, D)

    # ---- proj: Linear(D,2D) -> GELU -> Linear(2D,D) -> Dropout(identity) ----
    h = jnp.dot(y.astype(jnp.bfloat16), w1_ref[...],
                preferred_element_type=jnp.float32) + b1_ref[...]       # (TL, 2D)
    # tanh-approx GELU: transcendental runs on the EUP (<=~3e-3 abs deviation
    # from PyTorch's exact erf-GELU).
    h = 0.5 * h * (1.0 + jnp.tanh(0.7978845608028654 * (h + 0.044715 * h * h * h)))
    p = jnp.dot(h.astype(jnp.bfloat16), w2_ref[...],
                preferred_element_type=jnp.float32) + b2_ref[...]       # (TL, D)
    # TODO(synk): dropout is identity (eval mode); training mode would use
    # pltpu.prng_seed / pltpu.prng_random_bits with inverted-dropout scaling.

    # ---- residual (re-read from the tile ref; nothing pinned across steps) --
    o_ref[0] = (x_ref[0].astype(jnp.float32) + p).astype(o_ref.dtype)


# --------------------------------- wrapper ----------------------------------

def _tpu_vmem_capacity_bytes():
    try:
        return int(pltpu.get_tpu_info().vmem_capacity_bytes)
    except Exception:
        return 64 * 1024 * 1024         # conservative fallback (v7x-sized)


def _choose_l_tile(L, target):
    """Largest divisor of L <= target, preferring MXU/sublane-aligned sizes
    (multiples of 256, then 16, then 8)."""
    if L <= target:
        return L
    for step in (256, 16, 8):
        t = target - target % step
        while t >= step:
            if L % t == 0:
                return t
            t -= step
    return L


def bottleneck_resblock(x, params, l_tile=None):
    """x: (B, L, D) float32.  params: dict of arrays (see init_params)."""
    B, L, D = x.shape
    K = params["conv_w"].shape[0] // D
    assert K % 2 == 1 and K >= 3, "odd kernel size >= 3 expected"
    pad = K // 2

    vmem_cap = _tpu_vmem_capacity_bytes()
    # v7x: 64 MiB/TC -> smaller tiles & limit; v5e/v6e: 128 MiB -> go bigger.
    tl_target = 512 if vmem_cap <= 64 * 1024 * 1024 else 1024
    vmem_limit = int(vmem_cap * 3 // 4)

    TL = l_tile if l_tile is not None else _choose_l_tile(L, tl_target)
    assert L % TL == 0 and TL >= pad, (L, TL, pad)
    nlt = L // TL

    # Per-tile conv halo rows (pad above + pad below, zero outside the seq).
    # Tiny (2*pad/TL of x); built once in XLA, consumed tile-by-tile.
    xp = jnp.pad(x, ((0, 0), (pad, pad), (0, 0)))
    top = xp[:, :L, :].reshape(B, nlt, TL, D)[:, :, :pad, :]
    bot = xp[:, 2 * pad:, :].reshape(B, nlt, TL, D)[:, :, TL - pad:, :]
    halo = jnp.concatenate([top, bot], axis=2)          # (B, nlt, 2*pad, D)

    # Constant-index blocks: single-buffered (their block index never changes,
    # so the default double buffer would be pure VMEM waste).
    def const(shape):
        return pl.BlockSpec(shape, lambda b, l: (0,) * len(shape),
                            pipeline_mode=pl.Buffered(1))

    # TODO(synk): for D not a multiple of 128, padding the channel dim in the
    # wrapper would keep the tap concat / output stores lane-dense.
    flops = 2 * B * L * D * D * (K + 4)                  # conv + both linears
    transcendentals = B * L * 2 * D                      # tanh over (L, 2D)
    bytes_accessed = (2 * B * L * D * 4                  # x in + out
                      + B * nlt * 2 * pad * D * 4        # halo
                      + (K * D * D + 4 * D * D) * 2      # bf16 weights
                      + 6 * D * 4)                       # biases / ln params

    return pl.pallas_call(
        bottleneck_resblock_kernel,
        out_shape=jax.ShapeDtypeStruct((B, L, D), x.dtype),
        grid=(B, nlt),
        in_specs=[
            pl.BlockSpec((1, TL, D), lambda b, l: (b, l, 0)),             # x tile
            pl.BlockSpec((1, 1, 2 * pad, D), lambda b, l: (b, l, 0, 0)),  # halo
            const((1, D)),             # ln weight
            const((1, D)),             # ln bias
            const((K * D, D)),         # fused conv weight (bf16)
            const((1, D)),             # conv bias
            const((D, 2 * D)),         # w1 (bf16)
            const((1, 2 * D)),         # b1
            const((2 * D, D)),         # w2 (bf16)
            const((1, D)),             # b2
        ],
        out_specs=pl.BlockSpec((1, TL, D), lambda b, l: (b, l, 0)),
        compiler_params=pltpu.CompilerParams(
            dimension_semantics=("parallel", "parallel"),
            vmem_limit_bytes=vmem_limit,
        ),
        cost_estimate=pl.CostEstimate(
            flops=int(flops),
            transcendentals=int(transcendentals),
            bytes_accessed=int(bytes_accessed),
        ),
    )(x, halo, params["ln_w"], params["ln_b"], params["conv_w"],
      params["conv_b"], params["w1"], params["b1"], params["w2"], params["b2"])


def init_params(key, dim, kernel=3):
    """Deterministic synthetic parameters matching the nn.Module shapes."""
    ks = jax.random.split(key, 6)
    scale = 0.05
    ln_w = jnp.ones((1, dim), jnp.float32)          # nn.LayerNorm: weight = 1
    ln_b = jnp.zeros((1, dim), jnp.float32)         #               bias   = 0
    # nn.Conv1d(dim, dim, kernel): torch weight (out, in, K).
    conv_w_torch = scale * jax.random.normal(ks[0], (dim, dim, kernel), jnp.float32)
    # Fuse taps into (K*D_in, D_out) so the kernel does one deep matmul.
    conv_w = jnp.concatenate(
        [conv_w_torch[:, :, k].T for k in range(kernel)], axis=0
    ).astype(jnp.bfloat16)
    conv_b = scale * jax.random.normal(ks[1], (1, dim), jnp.float32)
    # nn.Linear(dim, 2*dim): torch weight (2D, D) -> stored transposed (D, 2D)
    w1 = (scale * jax.random.normal(ks[2], (dim, 2 * dim), jnp.float32)).astype(jnp.bfloat16)
    b1 = scale * jax.random.normal(ks[3], (1, 2 * dim), jnp.float32)
    # nn.Linear(2*dim, dim): torch weight (D, 2D) -> stored transposed (2D, D)
    w2 = (scale * jax.random.normal(ks[4], (2 * dim, dim), jnp.float32)).astype(jnp.bfloat16)
    b2 = scale * jax.random.normal(ks[5], (1, dim), jnp.float32)
    return dict(ln_w=ln_w, ln_b=ln_b, conv_w=conv_w, conv_b=conv_b,
                w1=w1, b1=b1, w2=w2, b2=b2)


def reference(x, params):
    """Pure-JAX f32 reference with exact erf-GELU (PyTorch semantics)."""
    B, L, D = x.shape
    K = params["conv_w"].shape[0] // D
    pad = K // 2
    xf = x.astype(jnp.float32)
    mu = jnp.mean(xf, -1, keepdims=True)
    var = jnp.mean((xf - mu) ** 2, -1, keepdims=True)
    xn = (xf - mu) / jnp.sqrt(var + 1e-5) * params["ln_w"][0] + params["ln_b"][0]
    xp = jnp.pad(xn, ((0, 0), (pad, pad), (0, 0)))
    wf = params["conv_w"].astype(jnp.float32)
    y = params["conv_b"][0]
    for k in range(K):
        y = y + xp[:, k:k + L, :] @ wf[k * D:(k + 1) * D, :]
    h = y @ params["w1"].astype(jnp.float32) + params["b1"][0]
    h = 0.5 * h * (1.0 + jax.scipy.special.erf(h / jnp.sqrt(2.0)))
    p = h @ params["w2"].astype(jnp.float32) + params["b2"][0]
    return xf + p


if __name__ == "__main__":
    key = jax.random.PRNGKey(0)
    kx, kp, kx2 = jax.random.split(key, 3)

    # Config 1: small single-tile case (TL == L).
    B, L, D = 2, 8, 32
    x = jax.random.normal(kx, (B, L, D), jnp.float32)
    params = init_params(kp, D, kernel=3)

    out = bottleneck_resblock(x, params)
    jax.block_until_ready(out)
    assert out.shape == (B, L, D) and out.dtype == jnp.float32
    err = float(jnp.max(jnp.abs(out - reference(x, params))))
    assert err < 5e-2, f"max abs error {err}"

    # Config 2: forced multi-tile case (exercises the halo / edge-mask path).
    L2 = 32
    x2 = jax.random.normal(kx2, (B, L2, D), jnp.float32)
    out2 = bottleneck_resblock(x2, params, l_tile=16)
    jax.block_until_ready(out2)
    err2 = float(jnp.max(jnp.abs(out2 - reference(x2, params))))
    assert err2 < 5e-2, f"max abs error {err2}"

    print("KERNEL_OK")
</pallas_src>

<mosaic_0001>
module attributes {stable_mosaic.version = 11 : i64} {
  func.func @bottleneck_resblock_kernel(%arg0: i32, %arg1: i32, %arg2: memref<1x8x32xf32, #tpu.memory_space<vmem>>, %arg3: memref<1x1x2x32xf32, #tpu.memory_space<vmem>>, %arg4: memref<1x32xf32, #tpu.memory_space<vmem>>, %arg5: memref<1x32xf32, #tpu.memory_space<vmem>>, %arg6: memref<96x32xbf16, #tpu.memory_space<vmem>>, %arg7: memref<1x32xf32, #tpu.memory_space<vmem>>, %arg8: memref<32x64xbf16, #tpu.memory_space<vmem>>, %arg9: memref<1x64xf32, #tpu.memory_space<vmem>>, %arg10: memref<64x32xbf16, #tpu.memory_space<vmem>>, %arg11: memref<1x32xf32, #tpu.memory_space<vmem>>, %arg12: memref<1x8x32xf32, #tpu.memory_space<vmem>>) attributes {dimension_semantics = [#tpu.dimension_semantics<parallel>, #tpu.dimension_semantics<parallel>], iteration_bounds = array<i64: 2, 1>, scalar_prefetch = 0 : i64, scratch_operands = 0 : i64, tpu.core_type = #tpu.core_type<tc>, window_params = [{transform_indices = @transform_0, window_bounds = array<i64: 1, 8, 32>}, {transform_indices = @transform_1, window_bounds = array<i64: 1, 1, 2, 32>}, {pipeline_mode = #tpu.pipeline_mode<synchronous>, transform_indices = @transform_2, window_bounds = array<i64: 1, 32>}, {pipeline_mode = #tpu.pipeline_mode<synchronous>, transform_indices = @transform_3, window_bounds = array<i64: 1, 32>}, {pipeline_mode = #tpu.pipeline_mode<synchronous>, transform_indices = @transform_4, window_bounds = array<i64: 96, 32>}, {pipeline_mode = #tpu.pipeline_mode<synchronous>, transform_indices = @transform_5, window_bounds = array<i64: 1, 32>}, {pipeline_mode = #tpu.pipeline_mode<synchronous>, transform_indices = @transform_6, window_bounds = array<i64: 32, 64>}, {pipeline_mode = #tpu.pipeline_mode<synchronous>, transform_indices = @transform_7, window_bounds = array<i64: 1, 64>}, {pipeline_mode = #tpu.pipeline_mode<synchronous>, transform_indices = @transform_8, window_bounds = array<i64: 64, 32>}, {pipeline_mode = #tpu.pipeline_mode<synchronous>, transform_indices = @transform_9, window_bounds = array<i64: 1, 32>}, {transform_indices = @transform_10, window_bounds = array<i64: 1, 8, 32>}]} {
    %c0 = arith.constant 0 : index
    %c0_0 = arith.constant 0 : index
    %0 = vector.load %arg4[%c0, %c0_0] : memref<1x32xf32, #tpu.memory_space<vmem>>, vector<1x32xf32>
    %c0_1 = arith.constant 0 : index
    %c0_2 = arith.constant 0 : index
    %1 = vector.load %arg5[%c0_1, %c0_2] : memref<1x32xf32, #tpu.memory_space<vmem>>, vector<1x32xf32>
    %c0_3 = arith.constant 0 : index
    %c0_4 = arith.constant 0 : index
    %c0_5 = arith.constant 0 : index
    %c0_6 = arith.constant 0 : index
    %2 = vector.load %arg3[%c0_3, %c0_4, %c0_5, %c0_6] : memref<1x1x2x32xf32, #tpu.memory_space<vmem>>, vector<1x1x1x32xf32>
    %3 = vector.shape_cast %2 : vector<1x1x1x32xf32> to vector<1x32xf32>
    %c0_7 = arith.constant 0 : index
    %c0_8 = arith.constant 0 : index
    %c0_9 = arith.constant 0 : index
    %4 = vector.load %arg2[%c0_7, %c0_8, %c0_9] : memref<1x8x32xf32, #tpu.memory_space<vmem>>, vector<1x8x32xf32>
    %5 = vector.shape_cast %4 : vector<1x8x32xf32> to vector<8x32xf32>
    %c0_10 = arith.constant 0 : index
    %c0_11 = arith.constant 0 : index
    %c1 = arith.constant 1 : index
    %c0_12 = arith.constant 0 : index
    %6 = vector.load %arg3[%c0_10, %c0_11, %c1, %c0_12] : memref<1x1x2x32xf32, #tpu.memory_space<vmem>>, vector<1x1x1x32xf32>
    %7 = vector.shape_cast %6 : vector<1x1x1x32xf32> to vector<1x32xf32>
    %8 = tpu.concatenate %3, %5, %7 in 0 : vector<1x32xf32>, vector<8x32xf32>, vector<1x32xf32> -> vector<10x32xf32>
    %cst = arith.constant dense<0.000000e+00> : vector<10xf32>
    %9 = vector.multi_reduction <add>, %8, %cst [1] : vector<10x32xf32> to vector<10xf32>
    %10 = vector.shape_cast %9 : vector<10xf32> to vector<10x1xf32>
    %cst_13 = arith.constant 3.200000e+01 : f32
    %11 = vector.broadcast %cst_13 : f32 to vector<10x1xf32>
    %12 = arith.divf %10, %11 : vector<10x1xf32>
    %13 = vector.broadcast %12 : vector<10x1xf32> to vector<10x32xf32>
    %14 = arith.subf %8, %13 : vector<10x32xf32>
    %15 = arith.mulf %14, %14 : vector<10x32xf32>
    %cst_14 = arith.constant dense<0.000000e+00> : vector<10xf32>
    %16 = vector.multi_reduction <add>, %15, %cst_14 [1] : vector<10x32xf32> to vector<10xf32>
    %17 = vector.shape_cast %16 : vector<10xf32> to vector<10x1xf32>
    %cst_15 = arith.constant 3.200000e+01 : f32
    %18 = vector.broadcast %cst_15 : f32 to vector<10x1xf32>
    %19 = arith.divf %17, %18 : vector<10x1xf32>
    %cst_16 = arith.constant 9.99999974E-6 : f32
    %20 = vector.broadcast %cst_16 : f32 to vector<10x1xf32>
    %21 = arith.addf %19, %20 : vector<10x1xf32>
    %22 = math.rsqrt %21 : vector<10x1xf32>
    %23 = vector.broadcast %22 : vector<10x1xf32> to vector<10x32xf32>
    %24 = arith.mulf %14, %23 : vector<10x32xf32>
    %25 = vector.broadcast %0 : vector<1x32xf32> to vector<10x32xf32>
    %26 = arith.mulf %24, %25 : vector<10x32xf32>
    %27 = vector.broadcast %1 : vector<1x32xf32> to vector<10x32xf32>
    %28 = arith.addf %26, %27 : vector<10x32xf32>
    %29 = tpu.iota {dimensions = array<i32: 0>} : vector<10x1xi32>
    %c8_i32 = arith.constant 8 : i32
    %30 = arith.muli %arg1, %c8_i32 : i32
    %c1_i32 = arith.constant 1 : i32
    %31 = arith.subi %30, %c1_i32 : i32
    %32 = vector.broadcast %31 : i32 to vector<10x1xi32>
    %33 = arith.addi %29, %32 : vector<10x1xi32>
    %c0_i32 = arith.constant 0 : i32
    %34 = vector.broadcast %c0_i32 : i32 to vector<10x1xi32>
    %35 = arith.cmpi sge, %33, %34 : vector<10x1xi32>
    %c8_i32_17 = arith.constant 8 : i32
    %36 = vector.broadcast %c8_i32_17 : i32 to vector<10x1xi32>
    %37 = arith.cmpi slt, %33, %36 : vector<10x1xi32>
    %38 = arith.andi %35, %37 : vector<10x1xi1>
    %cst_18 = arith.constant 0.000000e+00 : f32
    %39 = vector.shape_cast %38 : vector<10x1xi1> to vector<10x1xi1>
    %40 = vector.broadcast %39 : vector<10x1xi1> to vector<10x32xi1>
    %41 = vector.broadcast %cst_18 : f32 to vector<10x32xf32>
    %42 = arith.select %40, %28, %41 : vector<10x32xi1>, vector<10x32xf32>
    %43 = arith.truncf %42 : vector<10x32xf32> to vector<10x32xbf16>
    %44 = vector.extract_strided_slice %43 {offsets = [0, 0], sizes = [8, 32], strides = [1, 1]} : vector<10x32xbf16> to vector<8x32xbf16>
    %45 = vector.extract_strided_slice %43 {offsets = [1, 0], sizes = [8, 32], strides = [1, 1]} : vector<10x32xbf16> to vector<8x32xbf16>
    %46 = vector.extract_strided_slice %43 {offsets = [2, 0], sizes = [8, 32], strides = [1, 1]} : vector<10x32xbf16> to vector<8x32xbf16>
    %47 = tpu.concatenate %44, %45, %46 in 1 : vector<8x32xbf16>, vector<8x32xbf16>, vector<8x32xbf16> -> vector<8x96xbf16>
    %c0_19 = arith.constant 0 : index
    %c0_20 = arith.constant 0 : index
    %48 = vector.load %arg6[%c0_19, %c0_20] : memref<96x32xbf16, #tpu.memory_space<vmem>>, vector<96x32xbf16>
    %cst_21 = arith.constant dense<0.000000e+00> : vector<8x32xf32>
    %49 = tpu.matmul %47, %48, %cst_21 {dimension_numbers = #tpu.dot_dimension_numbers<[1], [0], [0], [1], [0, 0, 1, 1], [], []>} : vector<8x96xbf16>, vector<96x32xbf16>, vector<8x32xf32> -> vector<8x32xf32>
    %c0_22 = arith.constant 0 : index
    %c0_23 = arith.constant 0 : index
    %50 = vector.load %arg7[%c0_22, %c0_23] : memref<1x32xf32, #tpu.memory_space<vmem>>, vector<1x32xf32>
    %51 = vector.broadcast %50 : vector<1x32xf32> to vector<8x32xf32>
    %52 = arith.addf %49, %51 : vector<8x32xf32>
    %53 = arith.truncf %52 : vector<8x32xf32> to vector<8x32xbf16>
    %c0_24 = arith.constant 0 : index
    %c0_25 = arith.constant 0 : index
    %54 = vector.load %arg8[%c0_24, %c0_25] : memref<32x64xbf16, #tpu.memory_space<vmem>>, vector<32x64xbf16>
    %cst_26 = arith.constant dense<0.000000e+00> : vector<8x64xf32>
    %55 = tpu.matmul %53, %54, %cst_26 {dimension_numbers = #tpu.dot_dimension_numbers<[1], [0], [0], [1], [0, 0, 1, 1], [], []>} : vector<8x32xbf16>, vector<32x64xbf16>, vector<8x64xf32> -> vector<8x64xf32>
    %c0_27 = arith.constant 0 : index
    %c0_28 = arith.constant 0 : index
    %56 = vector.load %arg9[%c0_27, %c0_28] : memref<1x64xf32, #tpu.memory_space<vmem>>, vector<1x64xf32>
    %57 = vector.broadcast %56 : vector<1x64xf32> to vector<8x64xf32>
    %58 = arith.addf %55, %57 : vector<8x64xf32>
    %cst_29 = arith.constant 5.000000e-01 : f32
    %59 = vector.broadcast %cst_29 : f32 to vector<8x64xf32>
    %60 = arith.mulf %59, %58 : vector<8x64xf32>
    %cst_30 = arith.constant 4.471500e-02 : f32
    %61 = vector.broadcast %cst_30 : f32 to vector<8x64xf32>
    %62 = arith.mulf %61, %58 : vector<8x64xf32>
    %63 = arith.mulf %62, %58 : vector<8x64xf32>
    %64 = arith.mulf %63, %58 : vector<8x64xf32>
    %65 = arith.addf %58, %64 : vector<8x64xf32>
    %cst_31 = arith.constant 0.797884583 : f32
    %66 = vector.broadcast %cst_31 : f32 to vector<8x64xf32>
    %67 = arith.mulf %66, %65 : vector<8x64xf32>
    %68 = math.tanh %67 : vector<8x64xf32>
    %cst_32 = arith.constant 1.000000e+00 : f32
    %69 = vector.broadcast %cst_32 : f32 to vector<8x64xf32>
    %70 = arith.addf %69, %68 : vector<8x64xf32>
    %71 = arith.mulf %60, %70 : vector<8x64xf32>
    %72 = arith.truncf %71 : vector<8x64xf32> to vector<8x64xbf16>
    %c0_33 = arith.constant 0 : index
    %c0_34 = arith.constant 0 : index
    %73 = vector.load %arg10[%c0_33, %c0_34] : memref<64x32xbf16, #tpu.memory_space<vmem>>, vector<64x32xbf16>
    %cst_35 = arith.constant dense<0.000000e+00> : vector<8x32xf32>
    %74 = tpu.matmul %72, %73, %cst_35 {dimension_numbers = #tpu.dot_dimension_numbers<[1], [0], [0], [1], [0, 0, 1, 1], [], []>} : vector<8x64xbf16>, vector<64x32xbf16>, vector<8x32xf32> -> vector<8x32xf32>
    %c0_36 = arith.constant 0 : index
    %c0_37 = arith.constant 0 : index
    %75 = vector.load %arg11[%c0_36, %c0_37] : memref<1x32xf32, #tpu.memory_space<vmem>>, vector<1x32xf32>
    %76 = vector.broadcast %75 : vector<1x32xf32> to vector<8x32xf32>
    %77 = arith.addf %74, %76 : vector<8x32xf32>
    %c0_38 = arith.constant 0 : index
    %c0_39 = arith.constant 0 : index
    %c0_40 = arith.constant 0 : index
    %78 = vector.load %arg2[%c0_38, %c0_39, %c0_40] : memref<1x8x32xf32, #tpu.memory_space<vmem>>, vector<1x8x32xf32>
    %79 = vector.shape_cast %78 : vector<1x8x32xf32> to vector<8x32xf32>
    %80 = arith.addf %79, %77 : vector<8x32xf32>
    %c0_41 = arith.constant 0 : index
    %c0_42 = arith.constant 0 : index
    %c0_43 = arith.constant 0 : index
    %81 = vector.load %arg12[%c0_41, %c0_42, %c0_43] : memref<1x8x32xf32, #tpu.memory_space<vmem>>, vector<1x8x32xf32>
    %82 = vector.shape_cast %81 : vector<1x8x32xf32> to vector<8x32xf32>
    %83 = vector.shape_cast %80 : vector<8x32xf32> to vector<1x8x32xf32>
    tpu.vector_store %arg12[%c0_41, %c0_42, %c0_43], %83 {strides = array<i32>} : memref<1x8x32xf32, #tpu.memory_space<vmem>>, vector<1x8x32xf32>,
    return
  }
  func.func @transform_0(%arg0: i32, %arg1: i32) -> (i32, i32, i32) {
    %c0_i32 = arith.constant 0 : i32
    %c0_i32_0 = arith.constant 0 : i32
    return %arg0, %arg1, %c0_i32 : i32, i32, i32
  }
  func.func @transform_1(%arg0: i32, %arg1: i32) -> (i32, i32, i32, i32) {
    %c0_i32 = arith.constant 0 : i32
    %c0_i32_0 = arith.constant 0 : i32
    %c0_i32_1 = arith.constant 0 : i32
    return %arg0, %arg1, %c0_i32, %c0_i32_0 : i32, i32, i32, i32
  }
  func.func @transform_2(%arg0: i32, %arg1: i32) -> (i32, i32) {
    %c0_i32 = arith.constant 0 : i32
    %c0_i32_0 = arith.constant 0 : i32
    %c0_i32_1 = arith.constant 0 : i32
    return %c0_i32, %c0_i32_0 : i32, i32
  }
  func.func @transform_3(%arg0: i32, %arg1: i32) -> (i32, i32) {
    %c0_i32 = arith.constant 0 : i32
    %c0_i32_0 = arith.constant 0 : i32
    %c0_i32_1 = arith.constant 0 : i32
    return %c0_i32, %c0_i32_0 : i32, i32
  }
  func.func @transform_4(%arg0: i32, %arg1: i32) -> (i32, i32) {
    %c0_i32 = arith.constant 0 : i32
    %c0_i32_0 = arith.constant 0 : i32
    %c0_i32_1 = arith.constant 0 : i32
    return %c0_i32, %c0_i32_0 : i32, i32
  }
  func.func @transform_5(%arg0: i32, %arg1: i32) -> (i32, i32) {
    %c0_i32 = arith.constant 0 : i32
    %c0_i32_0 = arith.constant 0 : i32
    %c0_i32_1 = arith.constant 0 : i32
    return %c0_i32, %c0_i32_0 : i32, i32
  }
  func.func @transform_6(%arg0: i32, %arg1: i32) -> (i32, i32) {
    %c0_i32 = arith.constant 0 : i32
    %c0_i32_0 = arith.constant 0 : i32
    %c0_i32_1 = arith.constant 0 : i32
    return %c0_i32, %c0_i32_0 : i32, i32
  }
  func.func @transform_7(%arg0: i32, %arg1: i32) -> (i32, i32) {
    %c0_i32 = arith.constant 0 : i32
    %c0_i32_0 = arith.constant 0 : i32
    %c0_i32_1 = arith.constant 0 : i32
    return %c0_i32, %c0_i32_0 : i32, i32
  }
  func.func @transform_8(%arg0: i32, %arg1: i32) -> (i32, i32) {
    %c0_i32 = arith.constant 0 : i32
    %c0_i32_0 = arith.constant 0 : i32
    %c0_i32_1 = arith.constant 0 : i32
    return %c0_i32, %c0_i32_0 : i32, i32
  }
  func.func @transform_9(%arg0: i32, %arg1: i32) -> (i32, i32) {
    %c0_i32 = arith.constant 0 : i32
    %c0_i32_0 = arith.constant 0 : i32
    %c0_i32_1 = arith.constant 0 : i32
    return %c0_i32, %c0_i32_0 : i32, i32
  }
  func.func @transform_10(%arg0: i32, %arg1: i32) -> (i32, i32, i32) {
    %c0_i32 = arith.constant 0 : i32
    %c0_i32_0 = arith.constant 0 : i32
    return %arg0, %arg1, %c0_i32 : i32, i32, i32
  }
}

</mosaic_0001>

<bundles_post_ra>
// kernel: tpu_custom_call.1
= control target key start
LH: loop header
LB: loop body
LE: loop exit
PB: predicated region body
PF: predicated region fallthrough
CT: control target
= control target key end

     0   :  { %s1364_s0 = inlined_call_operand.vmem [shape: f32[2,8,32], index: 0, kind: input, shape index: {}]   ;;  %s1365_s1 = inlined_call_operand.vmem [shape: f32[2,1,2,32], index: 1, kind: input, shape index: {}]   ;;  %s1366_s2 = inlined_call_operand.vmem [shape: f32[1,32], index: 2, kind: input, shape index: {}]   ;;  %s1367_s3 = inlined_call_operand.vmem [shape: f32[1,32], index: 3, kind: input, shape index: {}]   ;;  %s1368_s4 = inlined_call_operand.vmem [shape: bf16[96,32], index: 4, kind: input, shape index: {}]   ;;  %s1369_s5 = inlined_call_operand.vmem [shape: f32[1,32], index: 5, kind: input, shape index: {}]   ;;  %s1370_s6 = inlined_call_operand.vmem [shape: bf16[32,64], index: 6, kind: input, shape index: {}]   ;;  %s1371_s7 = inlined_call_operand.vmem [shape: f32[1,64], index: 7, kind: input, shape index: {}]   ;;  %s1372_s8 = inlined_call_operand.vmem [shape: bf16[64,32], index: 8, kind: input, shape index: {}]   ;;  %s1373_s9 = inlined_call_operand.vmem [shape: f32[1,32], index: 9, kind: input, shape index: {}]   ;;  %s1374_s10 = inlined_call_operand.hbm [shape: f32[2,8,32], index: 10, kind: output, shape index: {}]  }
   0x1   :  { %1375 = sst [smem:[#allocation5_spill]] %s1364_s0 }
   0x2   :  { %15 = vsyncpa [#allocation3], 0 }
   0x3   :  { %17 = vsyncpa [#allocation3 + $0x1], 0  ;;  %s1167_s13 = smov 0   ;;  %s1169_s14 = smov 0  }
   0x4   :  { %s1171_s15 = smov 0   ;;  %s1173_s16 = smov 0  }
   0x5   :  { %s1175_s17 = smov 0   ;;  %s1177_s18 = smov 0  }
   0x6 LB: > { %s867_s19 = sadd.s32 4294967295, %s1105_s18   ;;  %s868_s20 = sadd.s32 4294967294, %s1105_s18   ;;  %s1105_s18 = sphi %s1177_s18, %s23_s18   ;;  %s1101_s17 = sphi %s1175_s17, %s1383_s17   ;;  %s1097_s16 = sphi %s1173_s16, %s1382_s16   ;;  %s1093_s15 = sphi %s1171_s15, %s1381_s15   ;;  %s1089_s14 = sphi %s1169_s14, %s1380_s14   ;;  %s1085_s13 = sphi %s1167_s13, %s1379_s13  }
   0x7   : > { %s35_s21 = sadd.s32 1, %s1101_s17  ;;  %s268_s22 = sadd.s32 1, %s1093_s15 }
   0x8   : > { %p37_p0 = scmp.ge.s32.totalorder %s35_s21, 2  ;;  %p278_p1 = scmp.ne.s32.totalorder %s1093_s15, %s1089_s14 }
   0x9   : > { %p279_p2 = scmp.eq.s32.totalorder %s867_s19, 1  ;;  %p284_p3 = scmp.ne.s32.totalorder %s1089_s14, %s1085_s13 }
   0xa   : > { %s1385_s21 = smov (%p37_p0, %s35_s21), 0  ;;  %p285_p5 = scmp.eq.s32.totalorder %s868_s20, 1 }
   0xb   : > { %p1207_p4 = por %p279_p2, %p278_p1  ;;  %s263_s24 = ssub.s32 %s1101_s17, %s1385_s21 }
   0xc   : > { %p871_p6 = scmp.ge.s32.totalorder %s1105_s18, 1  ;;  %p266_p7 = scmp.eq.s32.totalorder %s263_s24, 0 }
   0xd   : > { %p1214_p8 = por %p285_p5, %p284_p3  ;;  %p347_p9 = scmp.lt.s32.totalorder %s1105_s18, 3 }
   0xe   : > { %s1220_s26 = scalar_select %p266_p7, %s1093_s15, %s268_s22  }
   0xf   : > { %p348_p10 = pnand %p871_p6, %p347_p9 }
  0x10   : > { %p394_p11 = scmp.lt.s32.totalorder (!%p348_p10), %s1097_s16, 1  ;;  %vm420_vm0 = vcmask (!%p348_p10), 1040384   ;;  %vm423_vm1 = vcmask (!%p348_p10), 261120   ;;  %s1378_s0 = sld [smem:[#allocation5_spill]] (!%p348_p10)  ;;  %vm427_vm2 = vcmask (!%p348_p10), 254976   ;;  %v1009_v19 = vld [vmem:[%s1368_s4] sm:$0xff] (!%p348_p10)   ;;  %v468_v31 = vlaneseq (!%p348_p10) }
  0x11   : > { %351 = sbr.rel (%p348_p10) target bundleno = 1163 (0x48b), region = 60  ;;  %v1107_v20 = vmov (!%p348_p10), 0.0   ;;  %v1010_v21 = vld [vmem:[%s1368_s4 + $0x8] sm:$0xff] (!%p348_p10)   ;;  %v1011_v22 = vld [vmem:[%s1368_s4 + $0x10] sm:$0xff] (!%p348_p10)   ;;  %v1012_v23 = vld [vmem:[%s1368_s4 + $0x18] sm:$0xff] (!%p348_p10)   ;;  %vm1108_vm5 = vmmov (!%p348_p10), 0  }
  0x12   : > { %914 = vmatprep.subr.bf16.mxu0 (!%p348_p10), %v1107_v20  ;;  %930 = vmatprep.subr.bf16.mxu1 (!%p348_p10), %v1107_v20  ;;  %v1013_v24 = vld [vmem:[%s1368_s4 + $0x20] sm:$0xff] (!%p348_p10)   ;;  %v469_v32 = vshrl.u32 (!%p348_p10), %v468_v31, 7  ;;  %v1014_v37 = vld [vmem:[%s1368_s4 + $0x28] sm:$0xff] (!%p348_p10)   ;;  %s1109_s20 = smov (!%p348_p10), 64   ;;  %vm504_vm6 = vcmask (!%p348_p10), 523264   ;;  %vm562_vm7 = vcmask (!%p348_p10), 785408  }
  0x13   : > { %915 = vmatpush3.bf16.msra.mxu0 (!%p348_p10), %v1009_v19  ;;  %v875_v34 = vld [vmem:[%s1366_s2] ss:$0 sm:$0xff] (!%p348_p10)  ;;  %926 = vmatprep.mubr.msk.bf16.mxu0 (!%p348_p10), %vm1108_vm5, %v1107_v20  ;;  %v1016_v60 = vld [vmem:[%s1370_s6 + $0x8] sm:$0xff] (!%p348_p10)   ;;  %s391_s30 = sand.u32 (!%p348_p10), 1, %s1089_s14  }
  0x14   : > { %916 = vmatprep.subr.bf16.mxu0 (!%p348_p10), %v1107_v20  ;;  %v470_v35 = vadd.s32 (!%p348_p10), 8, %v469_v32  ;;  %v876_v40 = vld [vmem:[%s1367_s3] ss:$0 sm:$0xff] (!%p348_p10)  ;;  %v474_v41 = vadd.s32 (!%p348_p10), 4294967295, %v469_v32  ;;  %934 = vmatprep.mubr.msk.bf16.mxu1 (!%p348_p10), %vm1108_vm5, %v1107_v20  ;;  %s872_s11 = sshll.u32 (!%p348_p10), %s391_s30, 3 }
  0x15   : > { %v1015_v47 = vld [vmem:[%s1370_s6] sm:$0xff] (!%p348_p10)  }
  0x16   : > { %v475_v42 = vadd.s32 (!%p348_p10), 4294967295, %v470_v35  ;;  %vm476_vm3 = vcmp.ge.s32.totalorder (!%p348_p10), %v474_v41, 0  ;;  %931 = vmatpush3.bf16.msra.mxu1 (!%p348_p10), %v1015_v47  ;;  %v877_v61 = vld [vmem:[%s1369_s5] ss:$0 sm:$0xff] (!%p348_p10) }
  0x17   : > { %917 = vmatpush3.bf16.msra.mxu0 (!%p348_p10), %v1010_v21  ;;  %932 = vmatprep.subr.bf16.mxu1 (!%p348_p10), %v1107_v20 }
  0x18   : > { %s395_s27 = scalar_select %p394_p11, %s1097_s16, 1  ;;  %918 = vmatprep.subr.bf16.mxu0 %v1107_v20  ;;  %vm479_vm4 = vcmp.lt.s32.totalorder %v475_v42, 8 }
  0x1a   : > { %s873_s28 = sshll.u32 %s395_s27, 3  ;;  %s874_s29 = sshll.u32 %s395_s27, 1  ;;  %933 = vmatpush3.bf16.msra.mxu1 %v1016_v60 }
  0x1b   : > { %s400_s12 = scalar_lea.vmem %s1378_s0, %s873_s28  ;;  %s407_s24 = scalar_lea.vmem %s1365_s1, %s874_s29  ;;  %919 = vmatpush3.bf16.msra.mxu0 %v1011_v22  ;;  %938 = vmatprep.subr.bf16.mxu1 %v1107_v20 }
  0x1c   : > { %v411_v0 = vld [vmem:[%s407_s24] sm:$0x1]  ;;  %v413_v2 = vld [vmem:[%s407_s24 + $0x1] sm:$0x1]  ;;  %920 = vmatprep.subr.bf16.mxu0 %v1107_v20  ;;  %s1110_s24 = smov 32  }
  0x1d   : > { %v1230_v1 = vld [vmem:[%s400_s12] sm:$0xff]  ;;  %v418_v4 = vrot.slane %v413_v2, 7  ;;  %s1111_s12 = smov [#allocation2]  }
  0x1e   : > { %v415_v3 = vrot.slane %v1230_v1, 7  ;;  %s1031_s19 = sshll.u32 %s1111_s12, 4  ;;  %s1032_s19 = int_to_ptr.vmem [resolvable:$false] %s1031_s19 }
  0x1f   : > { %921 = vmatpush3.bf16.msra.mxu0 %v1012_v23  ;;  %s1033_s0 = scalar_lea.vmem %s1032_s19, 256 }
  0x20   : > { %v421_v5 = vsel %vm420_vm0, %v411_v0, %v415_v3  ;;  %v422_v6 = vsel %vm420_vm0, %v415_v3, %v418_v4  ;;  %922 = vmatprep.subr.bf16.mxu0 %v1107_v20 }
  0x21   : > { %v424_v7 = vsel %vm423_vm1, %v421_v5, 0.0  ;;  %v428_v8 = vsel %vm427_vm2, %v422_v6, 0.0 }
  0x22   : > { %425 = vadd.xlane.f32.xlu0 %v424_v7  ;;  %v1019_v7 = vld [vmem:[%s1372_s8 + $0x10] sm:$0xff]  }
  0x23   : > { %923 = vmatpush3.bf16.msra.mxu0 %v1013_v24 }
  0x24   : > { %924 = vmatprep.subr.bf16.mxu0 %v1107_v20 }
  0x26   : > { %429 = vadd.xlane.f32.xlu0 %v428_v8  ;;  %v1020_v8 = vld [vmem:[%s1372_s8 + $0x18] sm:$0xff]  }
  0x27   : > { %925 = vmatpush3.bf16.msra.mxu0 %v1014_v37 }
  0xaf   : > { %v426_v9 = vpop.xlane.xlu0 %425 }
  0xb0   : > { %v432_v10 = vmul.f32 0.03125, %v426_v9  ;;  %v885_v9 = vld [vmem:[%s1371_s7] ss:$0 sm:$0xff] }
  0xb2   : > { %v434_v11 = vsub.f32 %v421_v5, %v432_v10  ;;  %v1017_v5 = vld [vmem:[%s1372_s8] sm:$0xff]  }
  0xb3   : > { %v430_v12 = vpop.xlane.xlu0 %429 }
  0xb4   : > { %v433_v13 = vmul.f32 0.03125, %v430_v12  ;;  %v436_v14 = vmul.f32 %v434_v11, %v434_v11 }
  0xb6   : > { %v435_v15 = vsub.f32 %v422_v6, %v433_v13  ;;  %v438_v16 = vsel %vm423_vm1, %v436_v14, 0.0  ;;  %v1018_v6 = vld [vmem:[%s1372_s8 + $0x8] sm:$0xff]  }
  0xb7   : > { %439 = vadd.xlane.f32.xlu1 %v438_v16 }
  0xb8   : > { %v437_v17 = vmul.f32 %v435_v15, %v435_v15 }
  0xba   : > { %v441_v18 = vsel %vm427_vm2, %v437_v17, 0.0 }
  0xbb   : > { %442 = vadd.xlane.f32.xlu1 %v441_v18 }
 0x144   : > { %v440_v25 = vpop.xlane.xlu1 %439 }
 0x145   : > { %v444_v26 = vmul.f32 0.03125, %v440_v25  ;;  %v889_v25 = vld [vmem:[%s1373_s9] ss:$0 sm:$0xff] }
 0x147   : > { %v446_v27 = vadd.f32 1e-05, %v444_v26 }
 0x148   : > { %v443_v28 = vpop.xlane.xlu1 %442 }
 0x149   : > { %1021 = vrsqrt.f32 %v446_v27  ;;  %v445_v29 = vmul.f32 0.03125, %v443_v28 }
 0x14b   : > { %v447_v30 = vadd.f32 1e-05, %v445_v29 }
 0x14d   : > { %1023 = vrsqrt.f32 %v447_v30 }
 0x153   : > { %v1022_v33 = vpop.eup %1021 }
 0x154   : > { %v450_v36 = vmul.f32 %v1022_v33, %v434_v11 }
 0x156   : > { %v458_v38 = vmul.f32 %v875_v34, %v450_v36 }
 0x157   : > { %v1024_v39 = vpop.eup %1023 }
 0x158   : > { %v451_v43 = vmul.f32 %v1024_v39, %v435_v15  ;;  %v466_v45 = vadd.f32 %v876_v40, %v458_v38 }
 0x15a   : > { %v459_v44 = vmul.f32 %v875_v34, %v451_v43  ;;  %v486_v48 = vsel %vm476_vm3, %v466_v45, 0.0 }
 0x15c   : > { %v467_v46 = vadd.f32 %v876_v40, %v459_v44 }
 0x15e   : > { %v487_v49 = vsel %vm479_vm4, %v467_v46, 0.0 }
 0x15f   : > { %v488_v50 = vpack.c.bf16 %v487_v49, %v486_v48 }
 0x161   : > { %v499_v51 = vrot.slane %v488_v50, 1  ;;  %v492_v52 = vshll.u32 %v488_v50, 16  ;;  %v490_v53 = vshrl.u32 %v488_v50, 16 }
 0x163   : > { %500 = vrot.lane.b32.xlu1 %v499_v51, %s1109_s20  ;;  %v494_v54 = vrot.slane %v492_v52, 1  ;;  %s896_s20 = sshll.u32 %s1097_s16, 7  ;;  %s767_s16 = scalar_lea.sflag [#allocation3], %s391_s30 }
 0x164   : > { %s1316_s29 = scalar_lea.hbm %s1374_s10, %s896_s20 }
 0x165   : > { %v495_v55 = vor.u32 %v494_v54, %v490_v53 }
 0x167   : > { %496 = vrot.lane.b32.xlu0 %v495_v55, %s1110_s24  ;;  %s393_s24 = scalar_lea.vmem [#allocation2], %s872_s11 }
 0x168   : > { %s781_s22 = sshll.u32 %s393_s24, 4  ;;  %s1318_s22 = int_to_ptr.vmem [resolvable:$true] %s781_s22 }
 0x169   : > { %s1027_s11 = scalar_lea.vmem %s1318_s22, 128  ;;  %p1034_p1 = scmp.lt.s32.totalorder %s1318_s22, %s1032_s19 }
 0x16a   : > { %p1028_p12 = scmp.ne.s32.totalorder %s1318_s22, %s1027_s11  ;;  %p1035_p2 = scmp.lt.s32.totalorder %s1033_s0, %s1027_s11 }
 0x16c   : > { %p1029_p13 = pnand %p1028_p12, %p1207_p4  ;;  %p1036_p3 = por %p1035_p2, %p1034_p1 }
 0x16e   : > { %p1030_p0 = pneg %p1029_p13 }
 0x170   : > { %p1037_p5 = pnand %p1036_p3, %p1030_p0 }
 0x1d5   : > { %v501_v57 = vpop.permute.xlu1 %500 }
 0x1d9   : > { %v497_v56 = vpop.permute.xlu0 %496 }
 0x1da   : > { %v503_v58 = vsel %vm423_vm1, %v488_v50, %v497_v56 }
 0x1db   : > { %v506_v59 = vsel %vm504_vm6, %v503_v58, %v501_v57 }
 0x1dc   : > { %927 = vmatmul.mubr.msk.bf16.vlgmr.msra.gmra.mrb[0].mxu0 %vm562_vm7, %v506_v59 }
 0x2af   : > { %v599_v62 = vpop.f32.mrb[0].mxu0 }
 0x2b0   : > { %v600_v63 = vadd.f32 %v877_v61, %v599_v62  ;;  %v928_v0 = vpop.f32.mrb[1].mxu0 }
 0x2b1   : > { %v602_v2 = vpop.f32.mrb[2].mxu0 }
 0x2b2   : > { %v605_v3 = vpack.c.bf16 %v600_v63, %v600_v63  ;;  %v929_v4 = vpop.f32.mrb[3].mxu0 }
 0x2b4   : > { %935 = vmatmul.mubr.msk.bf16.vlgmr.msra.gmra.mrb[0].mxu1 %vm423_vm1, %v605_v3 }
 0x2b5   : > { %946 = vmatprep.mubr.msk.bf16.mxu1 %vm1108_vm5, %v1107_v20  ;;  %939 = vmatpush3.bf16.msra.mxu1 %v1017_v5 }
 0x2b6   : > { %940 = vmatprep.subr.bf16.mxu1 %v1107_v20 }
 0x2b9   : > { %941 = vmatpush3.bf16.msra.mxu1 %v1018_v6 }
 0x2ba   : > { %942 = vmatprep.subr.bf16.mxu1 %v1107_v20 }
 0x2bd   : > { %943 = vmatpush3.bf16.msra.mxu1 %v1019_v7 }
 0x2be   : > { %944 = vmatprep.subr.bf16.mxu1 %v1107_v20 }
 0x2c1   : > { %945 = vmatpush3.bf16.msra.mxu1 %v1020_v8 }
 0x387   : > { %v666_v10 = vpop.f32.mrb[0].mxu1 }
 0x388   : > { %v667_v11 = vadd.f32 %v885_v9, %v666_v10  ;;  %v936_v12 = vpop.f32.mrb[1].mxu1 }
 0x389   : > { %v669_v13 = vpop.f32.mrb[2].mxu1 }
 0x38a   : > { %v673_v14 = vmul.f32 0.044715, %v667_v11  ;;  %v937_v15 = vpop.f32.mrb[3].mxu1  ;;  %v672_v20 = vmul.f32 0.5, %v667_v11 }
 0x38c   : > { %v674_v16 = vmul.f32 %v673_v14, %v667_v11 }
 0x38e   : > { %v675_v17 = vmul.f32 %v674_v16, %v667_v11 }
 0x390   : > { %v676_v18 = vadd.f32 %v675_v17, %v667_v11 }
 0x392   : > { %v677_v19 = vmul.f32 0.7978846, %v676_v18 }
 0x394   : > { %1025 = vtanh.f32 %v677_v19 }
 0x39e   : > { %v1026_v21 = vpop.eup %1025 }
 0x39f   : > { %v679_v22 = vadd.f32 1.0, %v1026_v21 }
 0x3a1   : > { %v680_v23 = vmul.f32 %v679_v22, %v672_v20 }
 0x3a3   : > { %v681_v24 = vpack.c.bf16 %v680_v23, %v680_v23 }
 0x3a5   : > { %947 = vmatmul.mubr.msk.bf16.vlgmr.msra.gmra.mrb[4].mxu1 %vm504_vm6, %v681_v24 }
 0x478   : > { %v758_v26 = vpop.f32.mrb[4].mxu1 }
 0x479   : > { %v759_v27 = vadd.f32 %v889_v25, %v758_v26  ;;  %v948_v28 = vpop.f32.mrb[5].mxu1 }
 0x47a   : > { %v761_v29 = vpop.f32.mrb[6].mxu1 }
 0x47b   : > { %v764_v30 = vadd.f32 %v759_v27, %v1230_v1  ;;  %v949_v31 = vpop.f32.mrb[7].mxu1 }
 0x47d   : > { %765 = vst.msk [vmem:[%s393_s24] sm:$0xff] %vm423_vm1, %v764_v30 }
 0x47e   : > { %1040 = shalt.err (!%p1037_p5)
}
 0x47f   : > { %s1041_s30 = scalar_lea.hbm %s1316_s29, 128  ;;  %s1045_s27 = scalar_lea.hbm %s1374_s10, 256 }
 0x480   : > { %p1042_p6 = scmp.ne.s32.totalorder %s1316_s29, %s1041_s30  ;;  %p1046_p10 = scmp.lt.u32.totalorder %s1316_s29, %s1374_s10 }
 0x481   : > { %p1047_p11 = scmp.lt.u32.totalorder %s1045_s27, %s1041_s30  ;;  %p1049_p13 = scmp.lt.u32.totalorder %s1041_s30, %s1316_s29 }
 0x482   : > { %p1043_p7 = pnand %p1042_p6, %p1207_p4 }
 0x483   : > { %p1048_p12 = por %p1047_p11, %p1046_p10 }
 0x484   : > { %p1044_p9 = pneg %p1043_p7 }
 0x485   : > { %p1050_p0 = por %p1049_p13, %p1048_p12 }
 0x487   : > { %p1051_p1 = pnand %p1050_p0, %p1044_p9 }
 0x489   : > { %1054 = shalt.err (!%p1051_p1)
}
 0x48a   : > { %950 = dma.vmem_to_hbm [thread:$0]  (%p1207_p4), %s1318_s22, 128, %s1316_s29, %s767_s16  }
 0x48b PF: > { %p956_p2 = scmp.ge.s32.totalorder %s1105_s18, 2  ;;  %s793_s0 = sand.u32 1, %s1085_s13  }
 0x48c   : > { %s794_s11 = scalar_lea.sflag [#allocation3], %s793_s0 }
 0x48d   : > { %p953_p3 = pnand %p956_p2, %p1214_p8 }
 0x48f   : > { %1080 = dma.done.wait (!%p953_p3), %s794_s11, 128  }
 0x490   : > { %1082 = vsyncadd (!%p953_p3), %s794_s11, 4294967168  ;;  %s23_s18 = sadd.s32 1, %s1105_s18   ;;  %s1379_s13 = smov %s1089_s14 }
 0x491   : > { %p20_p5 = scmp.ge.s32.totalorder %s23_s18, 4   ;;  %s1380_s14 = smov %s1093_s15 }
 0x492   : > { %s1381_s15 = smov %s1220_s26  ;;  %s1382_s16 = smov %s1101_s17 }
 0x493   : > { %s1383_s17 = smov %s1385_s21  ;;  %22 = sbr.rel (!%p20_p5) target bundleno = 6 (0x6), region = 98 }
 0x49a   :  { %799 = vsyncpa [#allocation3], 1 }
 0x49b   :  { %801 = vsyncpa [#allocation3 + $0x1], 1 }

</bundles_post_ra>
